<compile_context>
chip_gen: v7x
topology: tpu7x:2x2x1
jax: 0.10.0
libtpu: 0.0.40
codegen_flags: <defaults>
</compile_context>

<pallas_src>
import functools

import jax
import jax.numpy as jnp
from jax.experimental import pallas as pl
from jax.experimental.pallas import tpu as pltpu

# Deterministic stand-in for `self.rand = random.randint(0, 1)` in __init__.
# TODO(synk): the PyTorch module samples `rand` per instance; here it is a
# frozen module-level constant (both branches are implemented and tested).
RAND = 0


def _relu_channel_rep_kernel(x_ref, o_ref):
    """One replica slab: relu(x) stored into the o_ref block (N,1,C,DHW)."""
    # Inserting the size-1 replica axis is a leading-dim reshape (free);
    # the store is a single unmasked full-tile vst.
    o_ref[...] = jnp.maximum(x_ref[...], 0.0)[:, None]


def _relu_spatial_rep_kernel(x_ref, o_ref, *, r2, r3):
    """One channel-replica slab with the 2x2 spatial replication folded in."""
    N, C, D, HW = x_ref.shape
    t = jnp.maximum(x_ref[...], 0.0)
    # Replication on the 1x tile: r3 is a sublane broadcast (axis just above
    # the lane axis), r2 is a leading-dim broadcast.  Both are cheap and done
    # before any expansion (optimization: last-axis replication first).
    t = jnp.broadcast_to(t[:, :, None, :, None, :], (N, C, r2, D, r3, HW))
    # Merging the leading (r2, D) dims is a layout no-op.
    o_ref[...] = t.reshape(N, C, r2 * D, r3, HW)


def _relu_cat_channels(x5d, rep):
    """relu(cat([x]*rep, dim=1)): replica grid axis + resident input tile."""
    N, C, D, H, W = x5d.shape
    DHW = D * H * W
    x3 = x5d.reshape(N, C, DHW)                       # contiguous, free
    out = pl.pallas_call(
        _relu_channel_rep_kernel,
        out_shape=jax.ShapeDtypeStruct((N, rep, C, DHW), x5d.dtype),
        grid=(rep,),
        # Input block index is constant across the replica axis -> stays
        # resident in VMEM (no re-DMA per replica).
        in_specs=[pl.BlockSpec((N, C, DHW), lambda r: (0, 0, 0))],
        # Each replica writes its own slab; last two block dims equal the
        # full array dims -> unmasked full-tile stores.
        out_specs=pl.BlockSpec((N, 1, C, DHW), lambda r: (0, r, 0, 0)),
        compiler_params=pltpu.CompilerParams(
            dimension_semantics=("parallel",)),
    )(x3)
    # contiguous, free: (N, rep, C, DHW) -> (N, rep*C, D, H, W)
    return out.reshape(N, rep * C, D, H, W)


def _relu_cat_all(x5d, rep, r2, r3):
    """relu of x replicated rep x along dim1, r2 x dim2, r3 x dim3 (fused)."""
    N, C, D, H, W = x5d.shape
    HW = H * W
    x4 = x5d.reshape(N, C, D, HW)                     # contiguous, free
    out = pl.pallas_call(
        functools.partial(_relu_spatial_rep_kernel, r2=r2, r3=r3),
        out_shape=jax.ShapeDtypeStruct((N, rep * C, r2 * D, r3, HW),
                                       x5d.dtype),
        grid=(rep,),
        # Resident input tile (index_map ignores the replica index).
        in_specs=[pl.BlockSpec((N, C, D, HW), lambda r: (0, 0, 0, 0))],
        # Channel-replica r selects rows [r*C, (r+1)*C) of the merged
        # rep*C axis (a leading dim, no alignment constraint); last two
        # block dims (r3, HW) equal the full array dims -> unmasked stores.
        out_specs=pl.BlockSpec((N, C, r2 * D, r3, HW),
                               lambda r: (0, r, 0, 0, 0)),
        compiler_params=pltpu.CompilerParams(
            dimension_semantics=("parallel",)),
    )(x4)
    # contiguous, free: trailing (r3, H*W) -> (r3*H, W)
    return out.reshape(N, rep * C, r2 * D, r3 * H, W)


def model_forward(x, rand=RAND):
    if not rand:
        # cat([x,x,x], dim=1) -> relu -> element 0 of the identical pair.
        return _relu_cat_channels(x, 3)
    # rand == 1: dim-1 factor 3*2*2*2 = 24, then dim-2 x2 and dim-3 x2,
    # all fused into a single kernel (single HBM write of the final tensor).
    return _relu_cat_all(x, 24, 2, 2)


def _reference(x, rand):
    ref = jnp.concatenate([x, x, x], axis=1)
    if rand:
        for _ in range(3):
            ref = jnp.concatenate([ref, ref], axis=1)
        ref = jnp.concatenate([ref, ref], axis=2)
        ref = jnp.concatenate([ref, ref], axis=3)
    return jnp.maximum(ref, 0.0)


if __name__ == "__main__":
    key = jax.random.PRNGKey(0)
    x = jax.random.normal(key, (2, 3, 4, 5, 6), dtype=jnp.float32)

    # Default executed branch (RAND == 0).
    out0 = jax.block_until_ready(model_forward(x, 0))
    ref0 = _reference(x, 0)
    assert out0.shape == ref0.shape, (out0.shape, ref0.shape)
    assert out0.dtype == ref0.dtype
    assert jnp.allclose(out0, ref0), "mismatch vs reference (rand=0)"

    # Also validate the fully fused rand == 1 branch.
    out1 = jax.block_until_ready(model_forward(x, 1))
    ref1 = _reference(x, 1)
    assert out1.shape == ref1.shape, (out1.shape, ref1.shape)
    assert out1.dtype == ref1.dtype
    assert jnp.allclose(out1, ref1), "mismatch vs reference (rand=1)"

    print("KERNEL_OK")
</pallas_src>

<mosaic_0001>
module attributes {stable_mosaic.version = 11 : i64} {
  func.func @_relu_channel_rep_kernel(%arg0: i32, %arg1: memref<2x3x120xf32, #tpu.memory_space<vmem>>, %arg2: memref<2x1x3x120xf32, #tpu.memory_space<vmem>>) attributes {dimension_semantics = [#tpu.dimension_semantics<parallel>], iteration_bounds = array<i64: 3>, scalar_prefetch = 0 : i64, scratch_operands = 0 : i64, tpu.core_type = #tpu.core_type<tc>, window_params = [{pipeline_mode = #tpu.pipeline_mode<synchronous>, transform_indices = @transform_0, window_bounds = array<i64: 2, 3, 120>}, {transform_indices = @transform_1, window_bounds = array<i64: 2, 1, 3, 120>}]} {
    %c0 = arith.constant 0 : index
    %c0_0 = arith.constant 0 : index
    %c0_1 = arith.constant 0 : index
    %0 = vector.load %arg1[%c0, %c0_0, %c0_1] : memref<2x3x120xf32, #tpu.memory_space<vmem>>, vector<2x3x120xf32>
    %cst = arith.constant 0.000000e+00 : f32
    %1 = vector.broadcast %cst : f32 to vector<2x3x120xf32>
    %2 = arith.maximumf %0, %1 : vector<2x3x120xf32>
    %3 = vector.shape_cast %2 : vector<2x3x120xf32> to vector<2x1x3x120xf32>
    %c0_2 = arith.constant 0 : index
    %c0_3 = arith.constant 0 : index
    %c0_4 = arith.constant 0 : index
    %c0_5 = arith.constant 0 : index
    %4 = vector.load %arg2[%c0_2, %c0_3, %c0_4, %c0_5] : memref<2x1x3x120xf32, #tpu.memory_space<vmem>>, vector<2x1x3x120xf32>
    tpu.vector_store %arg2[%c0_2, %c0_3, %c0_4, %c0_5], %3 {strides = array<i32>} : memref<2x1x3x120xf32, #tpu.memory_space<vmem>>, vector<2x1x3x120xf32>,
    return
  }
  func.func @transform_0(%arg0: i32) -> (i32, i32, i32) {
    %c0_i32 = arith.constant 0 : i32
    %c0_i32_0 = arith.constant 0 : i32
    %c0_i32_1 = arith.constant 0 : i32
    %c0_i32_2 = arith.constant 0 : i32
    return %c0_i32, %c0_i32_0, %c0_i32_1 : i32, i32, i32
  }
  func.func @transform_1(%arg0: i32) -> (i32, i32, i32, i32) {
    %c0_i32 = arith.constant 0 : i32
    %c0_i32_0 = arith.constant 0 : i32
    %c0_i32_1 = arith.constant 0 : i32
    %c0_i32_2 = arith.constant 0 : i32
    return %c0_i32, %arg0, %c0_i32_0, %c0_i32_1 : i32, i32, i32, i32
  }
}

</mosaic_0001>

<bundles_post_ra>
// kernel: tpu_custom_call.1
= control target key start
LH: loop header
LB: loop body
LE: loop exit
PB: predicated region body
PF: predicated region fallthrough
CT: control target
= control target key end

     0   :  { %s255_s6 = smov 0   ;;  %s257_s7 = smov 0   ;;  %s296_s0 = inlined_call_operand.vmem [shape: f32[2,3,120], index: 0, kind: input, shape index: {}]   ;;  %s297_s1 = inlined_call_operand.vmem [shape: f32[2,3,3,120], index: 1, kind: output, shape index: {}]  }
   0x1   :  { %s259_s8 = smov 0  }
   0x2 LB: > { %s188_s9 = sadd.s32 4294967295, %s243_s8   ;;  %s266_s10 = sadd.s32 1, %s243_s8   ;;  %s243_s8 = sphi %s259_s8, %s301_s8   ;;  %s239_s7 = sphi %s257_s7, %s300_s7   ;;  %s235_s6 = sphi %s255_s6, %s299_s6  }
   0x3   : > { %s36_s11 = ssub.s32 %s243_s8, %s266_s10  ;;  %s39_s12 = sadd.s32 1, %s239_s7 }
   0x4   : > { %p37_p0 = scmp.eq.s32.totalorder %s36_s11, 0  ;;  %p49_p1 = scmp.ne.s32.totalorder %s239_s7, %s235_s6 }
   0x5   : > { %p50_p2 = scmp.eq.s32.totalorder %s188_s9, 2  ;;  %p191_p3 = scmp.ge.s32.totalorder %s243_s8, 1 }
   0x6   : > { %s40_s13 = scalar_select %p37_p0, %s239_s7, %s39_s12  }
   0x7   : > { %p272_p4 = por %p50_p2, %p49_p1  ;;  %p77_p5 = scmp.lt.s32.totalorder %s243_s8, 4 }
   0x9   : > { %p78_p6 = pnand %p191_p3, %p77_p5 }
   0xa   : > { %s88_s15 = sand.u32 (!%p78_p6), 1, %s235_s6   ;;  %v91_v0 = vld [vmem:[%s296_s0] sm:$0x7] (!%p78_p6)  ;;  %vm95_vm0 = vcmask (!%p78_p6), 976896   ;;  %v92_v1 = vld [vmem:[%s296_s0 + $0x4] sm:$0x7] (!%p78_p6) }
   0xb   : > { %81 = sbr.rel (%p78_p6) target bundleno = 25 (0x19), region = 24  ;;  %s192_s20 = sshll.u32 (!%p78_p6), %s88_s15, 3  ;;  %v93_v2 = vmax.f32 (!%p78_p6), %v91_v0, 0.0  ;;  %v94_v3 = vmax.f32 (!%p78_p6), %v92_v1, 0.0 }
   0xc   : > { %s90_s21 = scalar_lea.vmem (!%p78_p6), [#allocation2], %s192_s20 }
   0xd   : > { %96 = vst.msk [vmem:[%s90_s21] sm:$0x7] (!%p78_p6), %vm95_vm0, %v93_v2  ;;  %97 = vst.msk [vmem:[%s90_s21 + $0x4] sm:$0x7] (!%p78_p6), %vm95_vm0, %v94_v3 }
  0x12   : > { %104 = sbr.rel (!%p272_p4) target bundleno = 25 (0x19), region = 28  ;;  %s194_s22 = sshll.u32 (%p272_p4), %s188_s9, 2 }
  0x13   : > { %s106_s25 = scalar_lea.vmem (%p272_p4), %s297_s1, %s194_s22 }
  0x14   : > { %v122_v4 = vld [vmem:[%s90_s21] sm:$0xf] (%p272_p4)  ;;  %v124_v5 = vld [vmem:[%s90_s21 + $0x4] sm:$0xf] (%p272_p4) }
  0x15   : > { %123 = vst [vmem:[%s106_s25] sm:$0xf] (%p272_p4), %v122_v4  ;;  %125 = vst [vmem:[%s106_s25 + $0xc] sm:$0xf] (%p272_p4), %v124_v5 }
  0x19 PF: > { %p8_p7 = scmp.ge.s32.totalorder %s266_s10, 5   ;;  %s299_s6 = smov %s239_s7 }
  0x1a   : > { %s300_s7 = smov %s40_s13  ;;  %s301_s8 = smov %s266_s10 }
  0x1b   :  { %10 = sbr.rel (!%p8_p7) target bundleno = 2 (0x2), region = 92 }

</bundles_post_ra>
